<compile_context>
chip_gen: v7x
topology: tpu7x:2x2x1
jax: 0.10.0
libtpu: 0.0.40
codegen_flags: <defaults>
</compile_context>

<pallas_src>
import functools

import numpy as np
import jax
import jax.numpy as jnp
from jax.experimental import pallas as pl
from jax.experimental.pallas import tpu as pltpu

_ON_TPU = jax.default_backend() == "tpu"
# Raises v5e's 16 MiB scoped default; equals the v6e/v7x default; leaves
# headroom on v7x's 64 MiB physical VMEM.
_VMEM_LIMIT_BYTES = 32 * 1024 * 1024


# ----------------------------------------------------------------------------
# Pallas kernels: out = A_row * x + G_row * eps
# ----------------------------------------------------------------------------

def _uniform_pm1(shape):
    """Uniform noise in [-1, 1) from the on-chip PRNG (call prng_seed first)."""
    bits = pltpu.prng_random_bits(shape)
    if bits.dtype != jnp.uint32:                       # trace-time check
        bits = pltpu.bitcast(bits, jnp.uint32)
    # Stuff 23 mantissa bits of a float in [1, 2), then rescale to [-1, 1).
    mant = jnp.bitwise_or(jnp.bitwise_and(bits, jnp.uint32(0x007FFFFF)),
                          jnp.uint32(0x3F800000))
    return (pltpu.bitcast(mant, jnp.float32) - jnp.float32(1.5)) * jnp.float32(2.0)


def _affine_store(x_ref, ag_ref, o_ref, noise):
    ag = ag_ref[...]                                   # (TR, 2) f32
    a = ag[:, 0:1]                                     # (TR, 1)
    g = ag[:, 1:2]                                     # (TR, 1)
    # Cast the native-dtype input block to f32 in-register (VPU has slack).
    o_ref[...] = x_ref[...].astype(jnp.float32) * a + g * noise


def _kernel_tpu(seed_ref, x_ref, ag_ref, o_ref):
    # TODO(synk): the noise stream is a function of (seed, block index), so it
    # changes if the row-block size changes (different shapes / tuning).
    pltpu.prng_seed(seed_ref[0], pl.program_id(0))
    _affine_store(x_ref, ag_ref, o_ref, _uniform_pm1(o_ref.shape))


def _kernel_tpu_debug(seed_ref, x_ref, ag_ref, o_ref, n_ref):
    pltpu.prng_seed(seed_ref[0], pl.program_id(0))
    noise = _uniform_pm1(o_ref.shape)
    _affine_store(x_ref, ag_ref, o_ref, noise)
    n_ref[...] = noise


def _kernel_hostnoise(x_ref, n_ref, ag_ref, o_ref):
    # Fallback for non-TPU backends: noise is a regular streamed input.
    _affine_store(x_ref, ag_ref, o_ref, n_ref[...])


def _row_block(n_rows, n_cols, itemsize, stream_bytes_per_elem,
               target_bytes=4 << 20):
    """Sublane-aligned row block for streaming an (n_rows, n_cols) slab."""
    align = 8 * max(1, 4 // max(1, itemsize))          # f32->8, bf16->16, i8->32
    bytes_per_row = max(1, n_cols) * stream_bytes_per_elem
    rows = max(align, (target_bytes // bytes_per_row) // align * align)
    # Keep >= 4 (or at least 2) grid steps when R permits: preserves BlockSpec
    # double-buffering (DMA/compute overlap) and gives v7x's 2nd TC blocks.
    cap4 = (n_rows // 4) // align * align
    cap2 = (n_rows // 2) // align * align
    if cap4 >= align:
        rows = min(rows, cap4)
    elif cap2 >= align:
        rows = min(rows, cap2)
    if rows >= n_rows:
        return n_rows                                  # tiny input: single block
    return rows


@functools.partial(jax.jit, static_argnames=("debug_noise",))
def _compose_fused_call(xb, ag, seed, *, debug_noise=False):
    """out[b,c,:] = ag[r,0]*xb[b,c,:] + ag[r,1]*eps[r,:], r = b*C + c.

    If debug_noise=True additionally returns the noise (used by the self-check
    only; the production path never writes noise to HBM on TPU).
    """
    B, C, T = xb.shape
    R = B * C
    x2d = xb.reshape(R, T)                             # layout no-op under jit
    # Lane-dense output: pad the time axis to a multiple of 128 when needed.
    Tp = -(-T // 128) * 128
    if Tp != T:
        x2d = jnp.pad(x2d, ((0, 0), (0, Tp - T)))
    itemsize = x2d.dtype.itemsize
    stream_b = itemsize + 4 + (0 if _ON_TPU else 4)    # in + out (+ host noise)
    TR = _row_block(R, Tp, itemsize, stream_b)
    grid = (pl.cdiv(R, TR),)

    out_t = jax.ShapeDtypeStruct((R, Tp), jnp.float32)
    cparams = pltpu.CompilerParams(
        dimension_semantics=("parallel",),             # v7x: shard over 2 TCs
        vmem_limit_bytes=_VMEM_LIMIT_BYTES,
    )

    if _ON_TPU:
        x_spec = pl.BlockSpec((TR, Tp), lambda i, seed_ref: (i, 0))
        ag_spec = pl.BlockSpec((TR, 2), lambda i, seed_ref: (i, 0))
        if debug_noise:
            kernel, out_shape, out_specs = (_kernel_tpu_debug,
                                            (out_t, out_t), (x_spec, x_spec))
        else:
            kernel, out_shape, out_specs = _kernel_tpu, out_t, x_spec
        res = pl.pallas_call(
            kernel,
            out_shape=out_shape,
            grid_spec=pltpu.PrefetchScalarGridSpec(
                num_scalar_prefetch=1,                 # PRNG seed lives in SMEM
                grid=grid,
                in_specs=[x_spec, ag_spec],
                out_specs=out_specs,
            ),
            compiler_params=cparams,
        )(seed.reshape(1).astype(jnp.int32), x2d, ag.astype(jnp.float32))
        out2d, noise2d = res if debug_noise else (res, None)
    else:
        # Non-TPU backend (CPU / interpret harness): pltpu.prng_* has no
        # lowering there, so generate the noise with jax.random and stream it.
        noise2d = jax.random.uniform(jax.random.PRNGKey(seed), (R, Tp),
                                     jnp.float32, minval=-1.0, maxval=1.0)
        x_spec = pl.BlockSpec((TR, Tp), lambda i: (i, 0))
        ag_spec = pl.BlockSpec((TR, 2), lambda i: (i, 0))
        out2d = pl.pallas_call(
            _kernel_hostnoise,
            out_shape=out_t,
            grid=grid,
            in_specs=[x_spec, x_spec, ag_spec],
            out_specs=x_spec,
            compiler_params=cparams,
        )(x2d, noise2d, ag.astype(jnp.float32))

    out2d = out2d[:, :T] if Tp != T else out2d
    out = out2d.reshape(B, C, T)
    if debug_noise:
        noise = (noise2d[:, :T] if Tp != T else noise2d).reshape(B, C, T)
        return out, noise
    return out


# ----------------------------------------------------------------------------
# Transform / Compose (forward-pass semantics mirrored from the PyTorch module)
# ----------------------------------------------------------------------------

def check_random_state(seed):
    if seed is None or isinstance(seed, (int, np.integer)):
        return np.random.RandomState(seed)
    if isinstance(seed, np.random.RandomState):
        return seed
    raise ValueError(f"Cannot use {seed} to seed an RNG.")


class Transform:
    """JAX mirror of braindecode's Transform base class (unfused fallback)."""

    def __init__(self, probability=1.0, random_state=None):
        assert 0.0 <= probability <= 1.0, "probability should be between 0 and 1."
        self._probability = float(probability)
        self.rng = check_random_state(random_state)

    def operation(self, X, y, **params):
        raise NotImplementedError

    def get_augmentation_params(self, *batch):
        return dict()

    def forward(self, X, y=None):
        X = jnp.asarray(X, jnp.float32)
        out_X = X if X.ndim >= 3 else X[None, ...]
        if y is not None:
            out_y = jnp.asarray(y)
            if out_y.ndim == 0:
                out_y = out_y.reshape(1)
        else:
            out_y = jnp.zeros(out_X.shape[0], dtype=jnp.float32)

        # Host-side Bernoulli mask (matches the numpy RNG semantics).
        mask = np.asarray(self.probability > self.rng.uniform(size=out_X.shape[0]))
        if int(mask.sum()) > 0:
            # TODO(synk): PyTorch uses data-dependent boolean fancy indexing
            # (out_X[mask]); on TPU we compute on the full batch and blend.
            tr_X, tr_y = self.operation(
                out_X, out_y, **self.get_augmentation_params(out_X, out_y))
            m = jnp.asarray(mask)
            out_X = jnp.where(m[:, None, None], tr_X, out_X)
            out_y = jnp.where(m, tr_y, out_y).astype(out_y.dtype)

        out_X = out_X.reshape(X.shape)
        if y is not None:
            return out_X, out_y
        return out_X

    def __call__(self, X, y=None):
        return self.forward(X, y)

    @property
    def probability(self):
        return self._probability


class SignFlip(Transform):
    def operation(self, X, y):
        return -X, y


class ChannelScale(Transform):
    def __init__(self, scale, probability=1.0, random_state=None):
        super().__init__(probability, random_state)
        self.scale = np.asarray(scale, np.float32)           # (C,)

    def operation(self, X, y):
        return X * jnp.asarray(self.scale)[None, :, None], y


class AddUniformNoise(Transform):
    """Adds sigma * U[-1, 1) noise; the fused Compose path generates the noise
    on-chip with the TPU PRNG from `seed` (jax.random on non-TPU backends)."""

    def __init__(self, sigma, seed, probability=1.0, random_state=None):
        super().__init__(probability, random_state)
        self.sigma = float(sigma)
        self.seed = int(seed)

    def get_augmentation_params(self, X, y):
        # TODO(synk): unfused fallback uses jax.random; its bits differ from the
        # on-chip TPU PRNG stream used by the fused Compose path.
        return dict(noise=jax.random.uniform(
            jax.random.PRNGKey(self.seed), X.shape, jnp.float32,
            minval=-1.0, maxval=1.0))

    def operation(self, X, y, noise):
        return X + jnp.float32(self.sigma) * noise, y


_FUSABLE = (SignFlip, ChannelScale, AddUniformNoise)


def _is_fusable(transforms):
    if not all(isinstance(t, _FUSABLE) for t in transforms):
        return False
    # The fused kernel owns a single noise field.
    return sum(isinstance(t, AddUniformNoise) for t in transforms) <= 1


def _fold_affine(transforms, B, C):
    """Fold the masked chain into out = A*x + G*eps (per (batch, channel)).

    Draws exactly one uniform(size=B) from each transform's RNG, in order —
    identical RNG consumption to the sequential path.
    """
    A = np.ones((B, C), np.float32)
    G = np.zeros((B, C), np.float32)
    seed = 0
    for t in transforms:
        mask = np.asarray(t.probability > t.rng.uniform(size=B))[:, None]   # (B,1)
        if isinstance(t, SignFlip):
            A = np.where(mask, -A, A)
            G = np.where(mask, -G, G)
        elif isinstance(t, ChannelScale):
            s = t.scale[None, :]                                            # (1,C)
            A = np.where(mask, A * s, A)
            G = np.where(mask, G * s, G)
        else:  # AddUniformNoise
            G = G + np.where(mask, np.float32(t.sigma), np.float32(0.0))
            seed = t.seed
    return A.astype(np.float32), G.astype(np.float32), seed


class Compose(Transform):
    """Transform composition.

    When the chain matches the supported affine pattern, the whole chain —
    including every transform's per-sample Bernoulli mask and the noise
    generation — is fused into a single streaming Pallas kernel.  Otherwise it
    falls back to chaining the transforms exactly like the PyTorch module.
    """

    def __init__(self, transforms):
        self.transforms = transforms
        super().__init__()

    def forward(self, X, y):
        if not _is_fusable(self.transforms):
            for transform in self.transforms:
                X, y = transform(X, y)
            return X, y

        X = jnp.asarray(X)                     # keep native dtype; kernel casts
        orig_shape = X.shape
        Xb = X if X.ndim >= 3 else X[None, ...]
        out_y = jnp.asarray(y)
        if out_y.ndim == 0:
            out_y = out_y.reshape(1)

        B, C, T = Xb.shape
        A, G, seed = _fold_affine(self.transforms, B, C)
        ag = np.stack([A.reshape(-1), G.reshape(-1)], axis=-1)              # (R,2)
        out = _compose_fused_call(Xb, jnp.asarray(ag), jnp.int32(seed),
                                  debug_noise=False)
        out_X = out.reshape(orig_shape)
        # Every fused operation leaves y unchanged (out_y[mask] = tr_y is identity).
        return out_X, out_y


# ----------------------------------------------------------------------------
# Demo / self-check
# ----------------------------------------------------------------------------

if __name__ == "__main__":
    B, C, T = 2, 4, 256
    key = jax.random.PRNGKey(0)
    kx, ky = jax.random.split(key)

    X = jax.random.normal(kx, (B, C, T), jnp.float32)
    y = jax.random.randint(ky, (B,), 0, 2).astype(jnp.int32)

    scale = np.linspace(0.5, 1.5, C, dtype=np.float32)
    sigma = 0.1
    noise_seed = 42

    # Probabilities chosen so the fixed seeds give mixed per-sample masks.
    probs = (1.0, 0.6, 0.3)
    seeds = (0, 1, 2)
    compose = Compose([
        SignFlip(probability=probs[0], random_state=seeds[0]),
        ChannelScale(scale, probability=probs[1], random_state=seeds[1]),
        AddUniformNoise(sigma, noise_seed, probability=probs[2], random_state=seeds[2]),
    ])

    out_X, out_y = compose(X, y)
    out_X = jax.block_until_ready(out_X)
    out_y = jax.block_until_ready(out_y)

    # --- Reference: replay the sequential per-transform semantics -----------
    # Masks: same host-side draws the transforms made (fresh RandomState with
    # the same seeds).  Noise: dumped from a debug run of the fused kernel
    # (same seed / shapes -> identical noise stream on either backend path).
    masks = [p > np.random.RandomState(s).uniform(size=B)
             for p, s in zip(probs, seeds)]
    m0, m1, m2 = (m[:, None] for m in masks)

    A_ref = np.ones((B, C), np.float32)
    G_ref = np.zeros((B, C), np.float32)
    A_ref = np.where(m0, -A_ref, A_ref)
    G_ref = np.where(m0, -G_ref, G_ref)
    A_ref = np.where(m1, A_ref * scale[None, :], A_ref)
    G_ref = np.where(m1, G_ref * scale[None, :], G_ref)
    G_ref = G_ref + np.where(m2, np.float32(sigma), np.float32(0.0))
    ag_ref = np.stack([A_ref.reshape(-1), G_ref.reshape(-1)], axis=-1)

    _, noise = _compose_fused_call(X, jnp.asarray(ag_ref), jnp.int32(noise_seed),
                                   debug_noise=True)
    noise = np.asarray(jax.block_until_ready(noise))
    assert noise.shape == (B, C, T)
    assert np.all(noise >= -1.0) and np.all(noise <= 1.0)

    Xn = np.asarray(X)
    x1 = np.where(masks[0][:, None, None], -Xn, Xn)
    x2 = np.where(masks[1][:, None, None], x1 * scale[None, :, None], x1)
    ref_X = np.where(masks[2][:, None, None], x2 + sigma * noise, x2)

    assert out_X.shape == X.shape and out_X.dtype == jnp.float32
    np.testing.assert_allclose(np.asarray(out_X), ref_X, rtol=1e-5, atol=1e-5)
    np.testing.assert_array_equal(np.asarray(out_y), np.asarray(y))

    print("KERNEL_OK")
</pallas_src>

<mosaic_0001>
module attributes {stable_mosaic.version = 11 : i64} {
  func.func @_kernel_hostnoise(%arg0: i32, %arg1: memref<8x256xf32, #tpu.memory_space<vmem>>, %arg2: memref<8x256xf32, #tpu.memory_space<vmem>>, %arg3: memref<8x2xf32, #tpu.memory_space<vmem>>, %arg4: memref<8x256xf32, #tpu.memory_space<vmem>>) attributes {dimension_semantics = [#tpu.dimension_semantics<parallel>], iteration_bounds = array<i64: 1>, scalar_prefetch = 0 : i64, scratch_operands = 0 : i64, tpu.core_type = #tpu.core_type<tc>, window_params = [{transform_indices = @transform_0, window_bounds = array<i64: 8, 256>}, {transform_indices = @transform_1, window_bounds = array<i64: 8, 256>}, {transform_indices = @transform_2, window_bounds = array<i64: 8, 2>}, {transform_indices = @transform_3, window_bounds = array<i64: 8, 256>}]} {
    %c0 = arith.constant 0 : index
    %c0_0 = arith.constant 0 : index
    %0 = vector.load %arg2[%c0, %c0_0] : memref<8x256xf32, #tpu.memory_space<vmem>>, vector<8x256xf32>
    %c0_1 = arith.constant 0 : index
    %c0_2 = arith.constant 0 : index
    %1 = vector.load %arg3[%c0_1, %c0_2] : memref<8x2xf32, #tpu.memory_space<vmem>>, vector<8x2xf32>
    %2 = vector.extract_strided_slice %1 {offsets = [0, 0], sizes = [8, 1], strides = [1, 1]} : vector<8x2xf32> to vector<8x1xf32>
    %3 = vector.extract_strided_slice %1 {offsets = [0, 1], sizes = [8, 1], strides = [1, 1]} : vector<8x2xf32> to vector<8x1xf32>
    %c0_3 = arith.constant 0 : index
    %c0_4 = arith.constant 0 : index
    %4 = vector.load %arg1[%c0_3, %c0_4] : memref<8x256xf32, #tpu.memory_space<vmem>>, vector<8x256xf32>
    %5 = vector.broadcast %2 : vector<8x1xf32> to vector<8x256xf32>
    %6 = arith.mulf %4, %5 : vector<8x256xf32>
    %7 = vector.broadcast %3 : vector<8x1xf32> to vector<8x256xf32>
    %8 = arith.mulf %7, %0 : vector<8x256xf32>
    %9 = arith.addf %6, %8 : vector<8x256xf32>
    %c0_5 = arith.constant 0 : index
    %c0_6 = arith.constant 0 : index
    %10 = vector.load %arg4[%c0_5, %c0_6] : memref<8x256xf32, #tpu.memory_space<vmem>>, vector<8x256xf32>
    tpu.vector_store %arg4[%c0_5, %c0_6], %9 {strides = array<i32>} : memref<8x256xf32, #tpu.memory_space<vmem>>, vector<8x256xf32>,
    return
  }
  func.func @transform_0(%arg0: i32) -> (i32, i32) {
    %c0_i32 = arith.constant 0 : i32
    %c0_i32_0 = arith.constant 0 : i32
    return %arg0, %c0_i32 : i32, i32
  }
  func.func @transform_1(%arg0: i32) -> (i32, i32) {
    %c0_i32 = arith.constant 0 : i32
    %c0_i32_0 = arith.constant 0 : i32
    return %arg0, %c0_i32 : i32, i32
  }
  func.func @transform_2(%arg0: i32) -> (i32, i32) {
    %c0_i32 = arith.constant 0 : i32
    %c0_i32_0 = arith.constant 0 : i32
    return %arg0, %c0_i32 : i32, i32
  }
  func.func @transform_3(%arg0: i32) -> (i32, i32) {
    %c0_i32 = arith.constant 0 : i32
    %c0_i32_0 = arith.constant 0 : i32
    return %arg0, %c0_i32 : i32, i32
  }
}

</mosaic_0001>

<bundles_post_ra>
// kernel: _compose_fused_call.1
= control target key start
LH: loop header
LB: loop body
LE: loop exit
PB: predicated region body
PF: predicated region fallthrough
CT: control target
= control target key end

     0   :  { %v44_v0 = vmov 0   ;;  %v45_v2 = vmov 1   ;;  %s87_s2 = inlined_call_operand.vmem [shape: f32[8,2], index: 2, kind: input, shape index: {}]   ;;  %s88_s0 = inlined_call_operand.vmem [shape: f32[8,256], index: 0, kind: input, shape index: {}]   ;;  %s89_s1 = inlined_call_operand.vmem [shape: f32[8,256], index: 1, kind: input, shape index: {}]   ;;  %s90_s3 = inlined_call_operand.vmem [shape: f32[8,256], index: 3, kind: output, shape index: {}]  }
   0x1   :  { %42 = vset.pattern.permute.xlu0 %v44_v0  ;;  %v16_v1 = vld [vmem:[%s87_s2] sm:$0xff]  ;;  %v18_v5 = vld [vmem:[%s88_s0 + $0x8] sm:$0xff] }
   0x2   :  { %21 = vperm.xlu0 %42, %v16_v1   ;;  %v17_v4 = vld [vmem:[%s88_s0] sm:$0xff]  ;;  %v15_v7 = vld [vmem:[%s89_s1 + $0x8] sm:$0xff] }
   0x3   :  { %v14_v6 = vld [vmem:[%s89_s1] sm:$0xff] }
   0x6   :  { %43 = vset.pattern.permute.xlu0 %v45_v2 }
   0x7   :  { %27 = vperm.xlu0 %43, %v16_v1  }
  0x81   :  { %v22_v3 = vpop.permute.xlu0 %21 }
  0x82   :  { %v24_v9 = vmul.f32 %v22_v3, %v17_v4  ;;  %v25_v10 = vmul.f32 %v22_v3, %v18_v5 }
  0x86   :  { %v28_v8 = vpop.permute.xlu0 %27 }
  0x87   :  { %v30_v11 = vmul.f32 %v28_v8, %v14_v6  ;;  %v31_v12 = vmul.f32 %v28_v8, %v15_v7 }
  0x89   :  { %v32_v13 = vadd.f32 %v30_v11, %v24_v9  ;;  %v33_v14 = vadd.f32 %v31_v12, %v25_v10 }
  0x8b   :  { %34 = vst [vmem:[%s90_s3] sm:$0xff] %v32_v13  ;;  %35 = vst [vmem:[%s90_s3 + $0x8] sm:$0xff] %v33_v14 }

</bundles_post_ra>
